<compile_context>
chip_gen: v6e
topology: v6e:2x2x1
jax: 0.10.0
libtpu: 0.0.40
codegen_flags: <defaults>
</compile_context>

<pallas_src>
import math

import jax
import jax.numpy as jnp
from jax.experimental import pallas as pl
from jax.experimental.pallas import tpu as pltpu

_LANE = 128


def _affine_norm_kernel(x_ref, scale_ref, shift_ref, o_ref):
    # (TM, W) * (1, W) + (1, W): pure VPU FMA in f32, cast only at the store.
    x = x_ref[...].astype(jnp.float32)
    o_ref[...] = (x * scale_ref[...] + shift_ref[...]).astype(o_ref.dtype)


def _vmem_capacity_bytes():
    try:
        cap = int(getattr(pltpu.get_tpu_info(), "vmem_capacity_bytes", 0))
        if cap > 0:
            return cap
    except Exception:
        pass
    return 64 << 20  # conservative: v7x per-TensorCore physical VMEM


def _pick_tile_rows(R, W, itemsize, block_budget_bytes):
    # Sublane packing: 8 rows for 4-byte, 16 for 2-byte, 32 for 1-byte dtypes.
    sublane = max(8, 32 // max(1, itemsize))
    bytes_per_row = W * itemsize
    # 2x double-buffered input + 2x double-buffered output blocks live at once.
    cap = block_budget_bytes // max(1, 4 * bytes_per_row)
    cap = max(sublane, (cap // sublane) * sublane)
    tm = min(cap, R)
    if tm < R:
        tm = max(sublane, (tm // sublane) * sublane)
    elif R >= 2 * sublane:
        # A single tile would cover everything: split so the "parallel" grid
        # axis has >= 2 steps (keeps both v7x TensorCores busy; ~0.35us extra
        # per step on single-TC chips, negligible at this size).
        half = (R + 1) // 2
        tm = max(sublane, ((half + sublane - 1) // sublane) * sublane)
    return tm


def _launch(x2, scale_row, shift_row):
    R, W = x2.shape
    itemsize = jnp.dtype(x2.dtype).itemsize
    vmem_cap = _vmem_capacity_bytes()
    block_budget = min(vmem_cap // 4, 32 << 20)          # for the 4 live blocks
    vmem_limit = int(min((vmem_cap * 3) // 4, 128 << 20))  # raised scoped limit

    TM = _pick_tile_rows(R, W, itemsize, block_budget)
    grid = (pl.cdiv(R, TM),)

    cost = pl.CostEstimate(
        flops=2 * R * W,
        transcendentals=0,
        bytes_accessed=2 * R * W * itemsize + 2 * W * 4,
    )

    return pl.pallas_call(
        _affine_norm_kernel,
        out_shape=jax.ShapeDtypeStruct((R, W), x2.dtype),
        grid=grid,
        in_specs=[
            pl.BlockSpec((TM, W), lambda i: (i, 0)),   # x tile
            pl.BlockSpec((1, W), lambda i: (0, 0)),    # scale (resident, f32)
            pl.BlockSpec((1, W), lambda i: (0, 0)),    # shift (resident, f32)
        ],
        out_specs=pl.BlockSpec((TM, W), lambda i: (i, 0)),
        compiler_params=pltpu.CompilerParams(
            dimension_semantics=("parallel",),
            vmem_limit_bytes=vmem_limit,
        ),
        cost_estimate=cost,
    )(x2, scale_row, shift_row)


def moving_batch_norm_forward(x, running_mean, running_var, weight=None,
                              bias=None, *, eps=1e-4, logpx=None,
                              min_kernel_bytes=128 * 1024):
    """Eval-path MovingBatchNormNd forward. x: (..., C), stats/params: (C,)."""
    orig_shape = x.shape
    C = orig_shape[-1]
    rows = math.prod(orig_shape[:-1]) if len(orig_shape) > 1 else 1

    # --- hoisted per-feature affine (exact torch formula), kept in float32 ---
    rv = running_var.astype(jnp.float32)
    rm = running_mean.astype(jnp.float32)
    inv_std = jnp.exp(-0.5 * jnp.log(rv + eps))
    if weight is not None:
        scale = inv_std * jnp.exp(weight.astype(jnp.float32))
        shift = bias.astype(jnp.float32) - rm * scale
    else:
        scale = inv_std
        shift = -rm * scale

    total_bytes = rows * C * jnp.dtype(x.dtype).itemsize
    if total_bytes < min_kernel_bytes:
        # Tiny problem: kernel launch + pipeline prologue dominate; let XLA
        # fuse the elementwise FMA instead.
        y = (x.astype(jnp.float32) * scale + shift).astype(x.dtype)
    else:
        x2 = x.reshape(rows, C)
        if C % _LANE == 0:
            # Already lane-dense.
            W = C
            scale_row = scale.reshape(1, W)
            shift_row = shift.reshape(1, W)
        else:
            fold = _LANE // math.gcd(C, _LANE)   # = lcm(C, 128) // C
            W = fold * C
            if W <= 8192 and rows % fold == 0:
                # Free (pure-view) repack to a lane-dense store width.
                x2 = x2.reshape(rows // fold, W)
                scale_row = jnp.tile(scale, fold).reshape(1, W)
                shift_row = jnp.tile(shift, fold).reshape(1, W)
            else:
                # Lane-sparse fallback: block width == full array width, so it
                # still compiles; padding to a lane-dense width would add a
                # full extra HBM pass, which costs more than the masked stores
                # it removes on this HBM-bound op.
                W = C
                scale_row = scale.reshape(1, W)
                shift_row = shift.reshape(1, W)
        y = _launch(x2, scale_row, shift_row).reshape(orig_shape)

    if logpx is None:
        return y
    # log-det term is a per-feature constant -> scalar sum; trivial plain JAX.
    logdet = -0.5 * jnp.log(rv + eps)
    if weight is not None:
        logdet = logdet + weight.astype(jnp.float32)
    return y, logpx - jnp.sum(logdet)


def reference(x, running_mean, running_var, weight, bias, eps):
    y = (x - running_mean) * jnp.exp(-0.5 * jnp.log(running_var + eps))
    if weight is not None:
        y = y * jnp.exp(weight) + bias
    return y


if __name__ == "__main__":
    key = jax.random.PRNGKey(0)
    k = jax.random.split(key, 10)
    eps = 1e-4

    # Case 1: PointFlow point clouds (B, N, 3); fold=128 -> lane-dense W=384.
    B, N, C = 2, 256, 3
    x1 = jax.random.normal(k[0], (B, N, C), jnp.float32)
    rm1 = 0.5 * jax.random.normal(k[1], (C,), jnp.float32)
    rv1 = jax.random.uniform(k[2], (C,), jnp.float32, 0.5, 1.5)
    w1 = 0.1 * jax.random.normal(k[3], (C,), jnp.float32)
    b1 = 0.1 * jax.random.normal(k[4], (C,), jnp.float32)
    y1 = moving_batch_norm_forward(x1, rm1, rv1, w1, b1, eps=eps,
                                   min_kernel_bytes=0)
    y1 = jax.block_until_ready(y1)
    assert y1.shape == x1.shape
    assert jnp.allclose(y1, reference(x1, rm1, rv1, w1, b1, eps),
                        atol=1e-5, rtol=1e-5), "mismatch (fold path, C=3)"

    # Case 1b: same data through the plain-JAX small-problem fallback.
    y1b = moving_batch_norm_forward(x1, rm1, rv1, w1, b1, eps=eps)
    y1b = jax.block_until_ready(y1b)
    assert jnp.allclose(y1b, y1, atol=1e-5, rtol=1e-5), "mismatch (fallback)"

    # Case 2: C=32, fold=4 -> W=128, multi-step grid (exercises megacore split).
    B2, N2, C2 = 2, 64, 32
    x2 = jax.random.normal(k[5], (B2, N2, C2), jnp.float32)
    rm2 = jnp.linspace(-0.3, 0.3, C2, dtype=jnp.float32)
    rv2 = jnp.linspace(0.7, 1.4, C2, dtype=jnp.float32)
    w2 = jnp.linspace(-0.05, 0.05, C2, dtype=jnp.float32)
    b2 = jnp.linspace(0.1, -0.1, C2, dtype=jnp.float32)
    y2 = moving_batch_norm_forward(x2, rm2, rv2, w2, b2, eps=eps,
                                   min_kernel_bytes=0)
    y2 = jax.block_until_ready(y2)
    assert jnp.allclose(y2, reference(x2, rm2, rv2, w2, b2, eps),
                        atol=1e-5, rtol=1e-5), "mismatch (fold path, C=32)"

    # Case 3: C=48 (fold=8 -> W=384) + logpx bookkeeping.
    C3 = 48
    x3 = jax.random.normal(k[6], (2, 16, C3), jnp.float32)
    rm3 = jnp.linspace(-0.2, 0.2, C3, dtype=jnp.float32)
    rv3 = jnp.linspace(0.8, 1.3, C3, dtype=jnp.float32)
    w3 = jnp.linspace(-0.04, 0.04, C3, dtype=jnp.float32)
    b3 = jnp.linspace(0.05, -0.05, C3, dtype=jnp.float32)
    logpx = jnp.zeros((2, 16, 1), jnp.float32)
    y3, lp3 = moving_batch_norm_forward(x3, rm3, rv3, w3, b3, eps=eps,
                                        logpx=logpx, min_kernel_bytes=0)
    y3 = jax.block_until_ready(y3)
    ref3 = reference(x3, rm3, rv3, w3, b3, eps)
    ref_lp = logpx - jnp.sum(-0.5 * jnp.log(rv3 + eps) + w3)
    assert jnp.allclose(y3, ref3, atol=1e-5, rtol=1e-5), "mismatch (C=48)"
    assert jnp.allclose(lp3, ref_lp, atol=1e-5, rtol=1e-5), "mismatch (logpx)"

    # Case 4: lane-sparse full-extent fallback (C=200, rows not a fold
    # multiple), affine disabled.
    C4 = 200
    x4 = jax.random.normal(k[7], (2, 4, C4), jnp.float32)
    rm4 = 0.3 * jax.random.normal(k[8], (C4,), jnp.float32)
    rv4 = jax.random.uniform(k[9], (C4,), jnp.float32, 0.6, 1.6)
    y4 = moving_batch_norm_forward(x4, rm4, rv4, None, None, eps=eps,
                                   min_kernel_bytes=0)
    y4 = jax.block_until_ready(y4)
    assert jnp.allclose(y4, reference(x4, rm4, rv4, None, None, eps),
                        atol=1e-5, rtol=1e-5), "mismatch (lane-sparse path)"

    print("KERNEL_OK")
</pallas_src>

<mosaic_0001>
module attributes {stable_mosaic.version = 11 : i64} {
  func.func @_affine_norm_kernel(%arg0: i32, %arg1: memref<4x384xf32, #tpu.memory_space<vmem>>, %arg2: memref<1x384xf32, #tpu.memory_space<vmem>>, %arg3: memref<1x384xf32, #tpu.memory_space<vmem>>, %arg4: memref<4x384xf32, #tpu.memory_space<vmem>>) attributes {dimension_semantics = [#tpu.dimension_semantics<parallel>], iteration_bounds = array<i64: 1>, scalar_prefetch = 0 : i64, scratch_operands = 0 : i64, tpu.core_type = #tpu.core_type<tc>, window_params = [{transform_indices = @transform_0, window_bounds = array<i64: 4, 384>}, {pipeline_mode = #tpu.pipeline_mode<synchronous>, transform_indices = @transform_1, window_bounds = array<i64: 1, 384>}, {pipeline_mode = #tpu.pipeline_mode<synchronous>, transform_indices = @transform_2, window_bounds = array<i64: 1, 384>}, {transform_indices = @transform_3, window_bounds = array<i64: 4, 384>}]} {
    %c0 = arith.constant 0 : index
    %c0_0 = arith.constant 0 : index
    %0 = vector.load %arg1[%c0, %c0_0] : memref<4x384xf32, #tpu.memory_space<vmem>>, vector<4x384xf32>
    %c0_1 = arith.constant 0 : index
    %c0_2 = arith.constant 0 : index
    %1 = vector.load %arg2[%c0_1, %c0_2] : memref<1x384xf32, #tpu.memory_space<vmem>>, vector<1x384xf32>
    %2 = vector.broadcast %1 : vector<1x384xf32> to vector<4x384xf32>
    %3 = arith.mulf %0, %2 : vector<4x384xf32>
    %c0_3 = arith.constant 0 : index
    %c0_4 = arith.constant 0 : index
    %4 = vector.load %arg3[%c0_3, %c0_4] : memref<1x384xf32, #tpu.memory_space<vmem>>, vector<1x384xf32>
    %5 = vector.broadcast %4 : vector<1x384xf32> to vector<4x384xf32>
    %6 = arith.addf %3, %5 : vector<4x384xf32>
    %c0_5 = arith.constant 0 : index
    %c0_6 = arith.constant 0 : index
    %7 = vector.load %arg4[%c0_5, %c0_6] : memref<4x384xf32, #tpu.memory_space<vmem>>, vector<4x384xf32>
    tpu.vector_store %arg4[%c0_5, %c0_6], %6 {strides = array<i32>} : memref<4x384xf32, #tpu.memory_space<vmem>>, vector<4x384xf32>,
    return
  }
  func.func @transform_0(%arg0: i32) -> (i32, i32) {
    %c0_i32 = arith.constant 0 : i32
    %c0_i32_0 = arith.constant 0 : i32
    return %arg0, %c0_i32 : i32, i32
  }
  func.func @transform_1(%arg0: i32) -> (i32, i32) {
    %c0_i32 = arith.constant 0 : i32
    %c0_i32_0 = arith.constant 0 : i32
    %c0_i32_1 = arith.constant 0 : i32
    return %c0_i32, %c0_i32_0 : i32, i32
  }
  func.func @transform_2(%arg0: i32) -> (i32, i32) {
    %c0_i32 = arith.constant 0 : i32
    %c0_i32_0 = arith.constant 0 : i32
    %c0_i32_1 = arith.constant 0 : i32
    return %c0_i32, %c0_i32_0 : i32, i32
  }
  func.func @transform_3(%arg0: i32) -> (i32, i32) {
    %c0_i32 = arith.constant 0 : i32
    %c0_i32_0 = arith.constant 0 : i32
    return %arg0, %c0_i32 : i32, i32
  }
}

</mosaic_0001>

<bundles_post_ra>
// kernel: tpu_custom_call.1
= control target key start
LH: loop header
LB: loop body
LE: loop exit
PB: predicated region body
PF: predicated region fallthrough
CT: control target
= control target key end

     0   :  { %8 = vsyncpa [#allocation3], 0  ;;  %s201_s0 = inlined_call_operand.hbm [shape: f32[4,384], index: 0, kind: input, shape index: {}]   ;;  %s202_s1 = inlined_call_operand.hbm [shape: f32[1,384], index: 1, kind: input, shape index: {}]   ;;  %s203_s2 = inlined_call_operand.vmem [shape: f32[1,384], index: 2, kind: input, shape index: {}]   ;;  %s204_s3 = inlined_call_operand.hbm [shape: f32[4,384], index: 3, kind: output, shape index: {}]  }
   0x1   :  { %9 = vsyncpa [#allocation6], 0 }
   0x2   :  { %10 = vsyncpa [#allocation4], 0  ;;  %s166_s12 = smov [#allocation2]   ;;  %s167_s14 = smov [#allocation5]  }
   0x3   :  { %s17_s13 = sshll.u32 %s166_s12, 4  ;;  %s27_s15 = sshll.u32 %s167_s14, 4  ;;  %s18_s13 = int_to_ptr.vmem [resolvable:$true] %s17_s13  ;;  %s28_s15 = int_to_ptr.vmem [resolvable:$true] %s27_s15 }
   0x4   :  { %s108_s16 = scalar_lea.vmem %s18_s13, 192  ;;  %p113_p1 = scmp.lt.s32.totalorder %s18_s13, %s18_s13 }
   0x5   :  { %p109_p0 = scmp.ne.s32.totalorder %s18_s13, %s108_s16  ;;  %p114_p2 = scmp.lt.s32.totalorder %s108_s16, %s108_s16 }
   0x7   :  { %p115_p3 = por %p114_p2, %p113_p1 }
   0x9   :  { %p116_p4 = pnand %p115_p3, %p109_p0 }
   0xb   :  { %119 = shalt.err (!%p116_p4)
}
   0xc   :  { %20 = dma.hbm_to_vmem [thread:$0]  %s201_s0, 192, %s18_s13, [#allocation3]  }
   0xd   :  { %s128_s19 = scalar_lea.vmem %s28_s15, 48  ;;  %s132_s20 = scalar_lea.vmem %s28_s15, 64 }
   0xe   :  { %p129_p5 = scmp.ne.s32.totalorder %s28_s15, %s128_s19  ;;  %p133_p6 = scmp.lt.s32.totalorder %s28_s15, %s28_s15 }
   0xf   :  { %p134_p7 = scmp.lt.s32.totalorder %s132_s20, %s128_s19 }
  0x11   :  { %p135_p8 = por %p134_p7, %p133_p6 }
  0x13   :  { %p136_p9 = pnand %p135_p8, %p129_p5 }
  0x15   :  { %139 = shalt.err (!%p136_p9)
}
  0x16   :  { %30 = dma.hbm_to_vmem [thread:$0]  %s202_s1, 48, %s28_s15, [#allocation6]  }
  0x17   :  { %160 = dma.done.wait [#allocation3], 192  }
  0x18   :  { %161 = vsyncadd [#allocation3], 4294967104 }
  0x19   :  { %162 = dma.done.wait [#allocation6], 48  }
  0x1a   :  { %163 = vsyncadd [#allocation6], 4294967248  ;;  %v43_v0 = vlaneseq  ;;  %v41_v5 = vld [vmem:[#allocation5] sm:$0x7]  ;;  %v60_v6 = vld [vmem:[%s203_s2] sm:$0x7] }
  0x1b   :  { %v40_v11 = vld [vmem:[#allocation2 + $0x8] sm:$0xf]  ;;  %v39_v12 = vld [vmem:[#allocation2] sm:$0xff]  ;;  %s168_s1 = smov [#allocation7]  }
  0x1c   :  { %v44_v1 = vshrl.u32 %v43_v0, 7  ;;  %s87_s24 = sshll.u32 %s168_s1, 4  ;;  %s88_s24 = int_to_ptr.vmem [resolvable:$true] %s87_s24 }
  0x1d   :  { %s140_s2 = scalar_lea.vmem %s88_s24, 192  ;;  %p145_p11 = scmp.lt.s32.totalorder %s88_s24, %s88_s24 }
  0x1e   :  { %v45_v2 = vsub.s32 0, %v44_v1  ;;  %v49_v3 = vsub.s32 1, %v44_v1  ;;  %v53_v4 = vsub.s32 2, %v44_v1  ;;  %p141_p10 = scmp.ne.s32.totalorder %s88_s24, %s140_s2  ;;  %p146_p12 = scmp.lt.s32.totalorder %s140_s2, %s140_s2 }
  0x20   :  { %v46_v7 = vrot.slane %v41_v5, %v45_v2  ;;  %v50_v8 = vrot.slane %v41_v5, %v49_v3  ;;  %v65_v9 = vrot.slane %v60_v6, %v45_v2  ;;  %v69_v10 = vrot.slane %v60_v6, %v49_v3  ;;  %p147_p13 = por %p146_p12, %p145_p11 }
  0x21   :  { %v54_v13 = vrot.slane %v41_v5, %v53_v4  ;;  %v73_v14 = vrot.slane %v60_v6, %v53_v4 }
  0x22   :  { %v56_v15 = vcombine.low %v46_v7, %v50_v8  ;;  %v75_v16 = vcombine.low %v65_v9, %v69_v10  ;;  %p148_p0 = pnand %p147_p13, %p141_p10 }
  0x23   :  { %v59_v17 = vmul.f32 %v54_v13, %v40_v11 }
  0x24   :  { %v58_v18 = vmul.f32 %v56_v15, %v39_v12 }
  0x25   :  { %v78_v19 = vadd.f32 %v73_v14, %v59_v17 }
  0x26   :  { %v77_v20 = vadd.f32 %v75_v16, %v58_v18 }
  0x27   :  { %80 = vst [vmem:[#allocation7 + $0x8] sm:$0xf] %v78_v19 }
  0x28   :  { %79 = vst [vmem:[#allocation7] sm:$0xff] %v77_v20 }
  0x29   :  { %151 = shalt.err (!%p148_p0)
}
  0x2a   :  { %90 = dma.vmem_to_hbm [thread:$0]  %s88_s24, 192, %s204_s3, [#allocation4]  }
  0x2b   :  { %164 = dma.done.wait [#allocation4], 192  }
  0x2c   :  { %165 = vsyncadd [#allocation4], 4294967104 }
  0x2d   :  { %94 = vsyncpa [#allocation3], 1 }
  0x2e   :  { %95 = vsyncpa [#allocation6], 1 }
  0x2f   :  { %96 = vsyncpa [#allocation4], 1 }

</bundles_post_ra>
